<compile_context>
chip_gen: v5e
topology: v5e:2x2
jax: 0.10.0
libtpu: 0.0.40
codegen_flags: <defaults>
</compile_context>

<pallas_src>
import functools
import math

import jax
import jax.numpy as jnp
from jax.experimental import pallas as pl
from jax.experimental.pallas import tpu as pltpu


def _round_up(x, m):
    return (x + m - 1) // m * m


# ---------------------------------------------------------------------------
# Pallas kernel factory
# ---------------------------------------------------------------------------
def _make_hier_router_kernel(*, n_tokens, tile_m, num_groups, group_top_k,
                             num_experts, stats_lanes):
    epg = num_experts // num_groups

    def kernel(x_ref, w1_ref, b1_ref, w2_ref, b2_ref, probs_ref, stats_ref):
        x = x_ref[...]                                          # [TM, H] bf16

        # ---- fused layer 1: group router + all G intra-group routers -------
        h = jnp.dot(x, w1_ref[...], preferred_element_type=jnp.float32)
        h = jnp.maximum(h + b1_ref[...], 0.0)                   # ReLU, f32

        # ---- fused layer 2 (block-diagonal): [group_logits | intra_logits] -
        logits = jnp.dot(h.astype(jnp.bfloat16), w2_ref[...],
                         preferred_element_type=jnp.float32) + b2_ref[...]
        g_logits = logits[:, :num_groups]                       # [TM, G]
        i_logits = logits[:, num_groups:num_groups + num_experts]  # [TM, E]

        # ---- group softmax (reciprocal -> EUP slot) -------------------------
        g_max = jnp.max(g_logits, axis=-1, keepdims=True)
        g_exp = jnp.exp(g_logits - g_max)
        g_probs = g_exp * pl.reciprocal(
            jnp.sum(g_exp, axis=-1, keepdims=True), approx=True)

        # ---- top-group gate (iterative argmax, first-index ties) -----------
        lane = jax.lax.broadcasted_iota(jnp.int32, g_probs.shape, 1)
        remaining = g_probs
        gate = jnp.zeros_like(g_probs)
        sel = jnp.zeros_like(g_probs)
        for _ in range(group_top_k):
            m = jnp.max(remaining, axis=-1, keepdims=True)
            cand = jnp.where(remaining >= m, lane, num_groups)
            first = lane == jnp.min(cand, axis=-1, keepdims=True)
            gate = jnp.where(first, g_probs, gate)
            sel = jnp.where(first, 1.0, sel)
            remaining = jnp.where(first, -jnp.inf, remaining)

        # ---- per-group softmax (shift-invariant -> one row max), in-register
        i_max = jnp.max(i_logits, axis=-1, keepdims=True)
        i_exp = jnp.exp(i_logits - i_max)
        parts = []
        for g in range(num_groups):
            eg = i_exp[:, g * epg:(g + 1) * epg]
            inv = pl.reciprocal(jnp.sum(eg, axis=-1, keepdims=True), approx=True)
            parts.append(eg * inv * gate[:, g:g + 1])
        probs = jnp.concatenate(parts, axis=-1)                  # [TM, E] f32
        probs_ref[...] = probs                                   # single store

        # ---- masked per-tile partial sums (ragged-last-block aware) --------
        row = (jax.lax.broadcasted_iota(jnp.int32, (tile_m, 1), 0)
               + pl.program_id(0) * tile_m)
        valid = row < n_tokens                                   # [TM, 1] bool
        gsum = jnp.sum(jnp.where(valid, g_probs, 0.0), axis=0, keepdims=True)
        ssum = jnp.sum(jnp.where(valid, sel, 0.0), axis=0, keepdims=True)
        esum = jnp.sum(jnp.where(valid, probs, 0.0), axis=0, keepdims=True)

        pieces = [gsum, ssum, esum]
        pad = stats_lanes - (2 * num_groups + num_experts)
        if pad > 0:
            pieces.append(jnp.zeros((1, pad), jnp.float32))
        stats = jnp.concatenate(pieces, axis=-1)                 # [1, 128]
        stats_ref[...] = jnp.broadcast_to(stats[None], (1, 8, stats_lanes))

    return kernel


# ---------------------------------------------------------------------------
# Wrapper: fused-weight prep, tiling, specs, pallas_call
# ---------------------------------------------------------------------------
def hierarchical_router_probs_pallas(x2d, params, *, num_groups, group_top_k,
                                     num_experts, tile_m=None):
    n_tokens, hidden = x2d.shape
    if tile_m is None:
        tile_m = min(512, _round_up(n_tokens, 16))   # multiple of 16 (bf16 tile)
    num_tiles = pl.cdiv(n_tokens, tile_m)
    epg = num_experts // num_groups

    h2 = params["w1g"].shape[1]
    h4 = params["w1i"].shape[2]
    k1 = h2 + num_groups * h4
    n2 = num_groups + num_experts
    stats_lanes = max(128, _round_up(2 * num_groups + num_experts, 128))

    # Fused first-layer weight [H, H/2 + G*H/4] and bias.
    w1cat = jnp.concatenate(
        [params["w1g"],
         jnp.transpose(params["w1i"], (1, 0, 2)).reshape(hidden, num_groups * h4)],
        axis=1).astype(jnp.bfloat16)
    b1cat = jnp.concatenate(
        [params["b1g"].reshape(1, h2),
         params["b1i"].reshape(1, num_groups * h4)], axis=1).astype(jnp.float32)

    # Fused block-diagonal second-layer weight [K1, G + E] and bias.
    w2cat = jnp.zeros((k1, n2), jnp.float32)
    w2cat = w2cat.at[:h2, :num_groups].set(params["w2g"])
    for g in range(num_groups):
        w2cat = w2cat.at[
            h2 + g * h4:h2 + (g + 1) * h4,
            num_groups + g * epg:num_groups + (g + 1) * epg].set(params["w2i"][g])
    w2cat = w2cat.astype(jnp.bfloat16)
    b2cat = jnp.concatenate(
        [params["b2g"].reshape(1, num_groups),
         params["b2i"].reshape(1, num_experts)], axis=1).astype(jnp.float32)

    # No full-array jnp.pad: rely on the ragged last block + in-kernel masking.
    # NOTE: bf16 operands give small numeric drift vs an f32 torch reference;
    # routing decisions are preserved.
    x_bf16 = x2d.astype(jnp.bfloat16)

    kernel = _make_hier_router_kernel(
        n_tokens=n_tokens, tile_m=tile_m, num_groups=num_groups,
        group_top_k=group_top_k, num_experts=num_experts,
        stats_lanes=stats_lanes)

    whole = lambda i: (0, 0)

    flops = 2 * n_tokens * (hidden * k1 + k1 * n2)
    transcendentals = n_tokens * (num_groups + num_experts + num_groups + 1)
    bytes_accessed = (x_bf16.size * 2
                      + 2 * (w1cat.size + w2cat.size)
                      + 4 * (b1cat.size + b2cat.size)
                      + 4 * n_tokens * num_experts
                      + 4 * num_tiles * 8 * stats_lanes)

    # VMEM budget: double-buffered weights + x / output tiles + f32 temps,
    # with headroom; capped below v7x's 64 MiB/TC physical VMEM.
    wbytes = 2 * (w1cat.size + w2cat.size) + 4 * (b1cat.size + b2cat.size)
    tile_bytes = tile_m * hidden * 2 + tile_m * num_experts * 4 + 8 * stats_lanes * 4
    inter_bytes = tile_m * (k1 + n2 + 2 * num_experts + 4 * num_groups) * 4
    est = 2 * (wbytes + tile_bytes) + inter_bytes
    vmem_limit = int(min(56 * 2 ** 20, max(32 * 2 ** 20, 2 * est)))

    grid_spec = pltpu.PrefetchScalarGridSpec(
        num_scalar_prefetch=0,
        grid=(num_tiles,),
        in_specs=[
            pl.BlockSpec((tile_m, hidden), lambda i: (i, 0)),   # x token tile
            pl.BlockSpec(w1cat.shape, whole),                   # resident weights
            pl.BlockSpec(b1cat.shape, whole),
            pl.BlockSpec(w2cat.shape, whole),
            pl.BlockSpec(b2cat.shape, whole),
        ],
        out_specs=(
            pl.BlockSpec((tile_m, num_experts), lambda i: (i, 0)),
            pl.BlockSpec((1, 8, stats_lanes), lambda i: (i, 0, 0)),
        ),
    )

    probs, stats = pl.pallas_call(
        kernel,
        grid_spec=grid_spec,
        out_shape=(
            jax.ShapeDtypeStruct((n_tokens, num_experts), jnp.float32),
            jax.ShapeDtypeStruct((num_tiles, 8, stats_lanes), jnp.float32),
        ),
        compiler_params=pltpu.CompilerParams(
            dimension_semantics=("parallel",),
            vmem_limit_bytes=vmem_limit,
        ),
        cost_estimate=pl.CostEstimate(
            flops=flops, transcendentals=transcendentals,
            bytes_accessed=bytes_accessed),
    )(x_bf16, w1cat, b1cat, w2cat, b2cat)

    gsum_total = jnp.sum(stats[:, 0, :num_groups], axis=0)               # [G]
    gsel_total = jnp.sum(stats[:, 0, num_groups:2 * num_groups], axis=0)  # [G]
    esum_total = jnp.sum(
        stats[:, 0, 2 * num_groups:2 * num_groups + num_experts], axis=0)  # [E]
    return probs, gsum_total, gsel_total, esum_total


# ---------------------------------------------------------------------------
# Glue: capacity-limited dispatch / combine (vectorized; matches the sequential
# (b, s, k) counter of the PyTorch reference via exclusive cumsum)
# ---------------------------------------------------------------------------
def create_dispatch_combine(top_k_indices, top_k_probs, capacity, num_experts):
    B, S, K = top_k_indices.shape
    n_entries = B * S * K
    flat_e = top_k_indices.reshape(-1).astype(jnp.int32)
    flat_p = top_k_probs.reshape(-1).astype(jnp.float32)

    one_hot_e = jax.nn.one_hot(flat_e, num_experts, dtype=jnp.int32)
    pos = jnp.sum((jnp.cumsum(one_hot_e, axis=0) - one_hot_e) * one_hot_e, axis=-1)
    valid = pos < capacity
    safe_pos = jnp.minimum(pos, capacity - 1)

    ent = jnp.arange(n_entries)
    b_idx = ent // (S * K)
    s_idx = (ent // K) % S

    dispatch = jnp.zeros((B, S, num_experts, capacity), jnp.float32).at[
        b_idx, s_idx, flat_e, safe_pos].add(jnp.where(valid, 1.0, 0.0))
    combine = jnp.zeros((B, S, num_experts, capacity), jnp.float32).at[
        b_idx, s_idx, flat_e, safe_pos].add(jnp.where(valid, flat_p, 0.0))
    return dispatch, combine


# ---------------------------------------------------------------------------
# Full HierarchicalRouter forward
# ---------------------------------------------------------------------------
def hierarchical_router_forward(hidden_states, params, *, num_experts, num_groups,
                                top_k=2, group_top_k=1, capacity_factor=1.5):
    # TODO(synk): expert_mask arg and the running-stat buffers of the PyTorch
    # module (total_tokens / expert_usage_count / routing_decisions) are not
    # part of the functional forward outputs and are not implemented.
    batch, seq, hidden = hidden_states.shape
    n_tokens = batch * seq
    top_k = min(top_k, num_experts)
    k_groups = min(group_top_k, num_groups)

    x2d = hidden_states.reshape(n_tokens, hidden)
    probs2d, gsum, gsel, esum = hierarchical_router_probs_pallas(
        x2d, params, num_groups=num_groups, group_top_k=k_groups,
        num_experts=num_experts)
    final_expert_probs = probs2d.reshape(batch, seq, num_experts)

    # top-k experts + renormalization
    top_k_probs, top_k_indices = jax.lax.top_k(final_expert_probs, top_k)
    top_k_probs = top_k_probs / (jnp.sum(top_k_probs, axis=-1, keepdims=True) + 1e-8)

    capacity = int(n_tokens * capacity_factor * top_k / num_experts)
    dispatch_tensor, combine_tensor = create_dispatch_combine(
        top_k_indices, top_k_probs, capacity, num_experts)

    # group-level balance loss
    group_prob_per_group = gsum / n_tokens
    group_usage_rate = gsel / (n_tokens * k_groups)
    group_balance_loss = jnp.sum(group_prob_per_group * group_usage_rate) * num_groups

    # expert-level balance loss
    router_prob_per_expert = esum / n_tokens
    expert_counts = jnp.sum(
        jax.nn.one_hot(top_k_indices.reshape(-1), num_experts, dtype=jnp.float32),
        axis=0)
    expert_usage_rate = expert_counts / (n_tokens * top_k)
    expert_balance_loss = jnp.sum(router_prob_per_expert * expert_usage_rate) * num_experts

    aux_loss = group_balance_loss + expert_balance_loss
    return dispatch_tensor, combine_tensor, final_expert_probs, aux_loss


# ---------------------------------------------------------------------------
# Deterministic parameter init (xavier_normal weights, zero biases)
# ---------------------------------------------------------------------------
def init_hierarchical_router_params(key, hidden_size, num_experts, num_groups):
    assert num_experts % num_groups == 0 and hidden_size % 4 == 0
    h2 = hidden_size // 2
    h4 = hidden_size // 4
    epg = num_experts // num_groups
    keys = jax.random.split(key, 2 + 2 * num_groups)

    def xavier(k, fan_in, fan_out):
        std = math.sqrt(2.0 / (fan_in + fan_out))
        return jax.random.normal(k, (fan_in, fan_out), jnp.float32) * std

    return {
        "w1g": xavier(keys[0], hidden_size, h2),
        "b1g": jnp.zeros((1, h2), jnp.float32),
        "w2g": xavier(keys[1], h2, num_groups),
        "b2g": jnp.zeros((1, num_groups), jnp.float32),
        "w1i": jnp.stack([xavier(keys[2 + g], hidden_size, h4)
                          for g in range(num_groups)], axis=0),      # [G, H, H/4]
        "b1i": jnp.zeros((num_groups, 1, h4), jnp.float32),
        "w2i": jnp.stack([xavier(keys[2 + num_groups + g], h4, epg)
                          for g in range(num_groups)], axis=0),      # [G, H/4, epg]
        "b2i": jnp.zeros((num_groups, 1, epg), jnp.float32),
    }


if __name__ == "__main__":
    B, S, H = 2, 8, 32
    num_experts, num_groups = 8, 4
    top_k, group_top_k = 2, 1
    capacity_factor = 1.5

    key = jax.random.PRNGKey(0)
    kx, kp = jax.random.split(key)
    hidden_states = jax.random.normal(kx, (B, S, H), jnp.float32)
    params = init_hierarchical_router_params(kp, H, num_experts, num_groups)

    fwd = jax.jit(functools.partial(
        hierarchical_router_forward, num_experts=num_experts,
        num_groups=num_groups, top_k=top_k, group_top_k=group_top_k,
        capacity_factor=capacity_factor))

    dispatch, combine, router_probs, aux_loss = fwd(hidden_states, params)
    jax.block_until_ready((dispatch, combine, router_probs, aux_loss))

    # sanity checks
    capacity = int(B * S * capacity_factor * top_k / num_experts)
    assert router_probs.shape == (B, S, num_experts)
    assert dispatch.shape == (B, S, num_experts, capacity)
    assert combine.shape == (B, S, num_experts, capacity)
    assert bool(jnp.all(jnp.isfinite(router_probs)))
    assert bool(jnp.all(router_probs >= 0.0))
    # per-token expert probs sum to the selected group's probability (<= 1)
    assert bool(jnp.all(router_probs.sum(-1) <= 1.0 + 1e-2))
    assert bool(jnp.isfinite(aux_loss))

    print("KERNEL_OK")
</pallas_src>

<mosaic_0001>
module attributes {stable_mosaic.version = 11 : i64} {
  func.func @kernel(%arg0: i32, %arg1: memref<16x32xbf16, #tpu.memory_space<vmem>>, %arg2: memref<32x48xbf16, #tpu.memory_space<vmem>>, %arg3: memref<1x48xf32, #tpu.memory_space<vmem>>, %arg4: memref<48x12xbf16, #tpu.memory_space<vmem>>, %arg5: memref<1x12xf32, #tpu.memory_space<vmem>>, %arg6: memref<16x8xf32, #tpu.memory_space<vmem>>, %arg7: memref<1x8x128xf32, #tpu.memory_space<vmem>>) attributes {dimension_semantics = [#tpu.dimension_semantics<parallel>], iteration_bounds = array<i64: 1>, scalar_prefetch = 0 : i64, scratch_operands = 0 : i64, tpu.core_type = #tpu.core_type<tc>, window_params = [{transform_indices = @transform_0, window_bounds = array<i64: 16, 32>}, {pipeline_mode = #tpu.pipeline_mode<synchronous>, transform_indices = @transform_1, window_bounds = array<i64: 32, 48>}, {pipeline_mode = #tpu.pipeline_mode<synchronous>, transform_indices = @transform_2, window_bounds = array<i64: 1, 48>}, {pipeline_mode = #tpu.pipeline_mode<synchronous>, transform_indices = @transform_3, window_bounds = array<i64: 48, 12>}, {pipeline_mode = #tpu.pipeline_mode<synchronous>, transform_indices = @transform_4, window_bounds = array<i64: 1, 12>}, {transform_indices = @transform_5, window_bounds = array<i64: 16, 8>}, {transform_indices = @transform_6, window_bounds = array<i64: 1, 8, 128>}]} {
    %c0 = arith.constant 0 : index
    %c0_0 = arith.constant 0 : index
    %0 = vector.load %arg1[%c0, %c0_0] : memref<16x32xbf16, #tpu.memory_space<vmem>>, vector<16x32xbf16>
    %c0_1 = arith.constant 0 : index
    %c0_2 = arith.constant 0 : index
    %1 = vector.load %arg2[%c0_1, %c0_2] : memref<32x48xbf16, #tpu.memory_space<vmem>>, vector<32x48xbf16>
    %cst = arith.constant dense<0.000000e+00> : vector<16x48xf32>
    %2 = tpu.matmul %0, %1, %cst {dimension_numbers = #tpu.dot_dimension_numbers<[1], [0], [0], [1], [0, 0, 1, 1], [], []>} : vector<16x32xbf16>, vector<32x48xbf16>, vector<16x48xf32> -> vector<16x48xf32>
    %c0_3 = arith.constant 0 : index
    %c0_4 = arith.constant 0 : index
    %3 = vector.load %arg3[%c0_3, %c0_4] : memref<1x48xf32, #tpu.memory_space<vmem>>, vector<1x48xf32>
    %4 = vector.broadcast %3 : vector<1x48xf32> to vector<16x48xf32>
    %5 = arith.addf %2, %4 : vector<16x48xf32>
    %cst_5 = arith.constant 0.000000e+00 : f32
    %6 = vector.broadcast %cst_5 : f32 to vector<16x48xf32>
    %7 = arith.maximumf %5, %6 : vector<16x48xf32>
    %8 = arith.truncf %7 : vector<16x48xf32> to vector<16x48xbf16>
    %c0_6 = arith.constant 0 : index
    %c0_7 = arith.constant 0 : index
    %9 = vector.load %arg4[%c0_6, %c0_7] : memref<48x12xbf16, #tpu.memory_space<vmem>>, vector<48x12xbf16>
    %cst_8 = arith.constant dense<0.000000e+00> : vector<16x12xf32>
    %10 = tpu.matmul %8, %9, %cst_8 {dimension_numbers = #tpu.dot_dimension_numbers<[1], [0], [0], [1], [0, 0, 1, 1], [], []>} : vector<16x48xbf16>, vector<48x12xbf16>, vector<16x12xf32> -> vector<16x12xf32>
    %c0_9 = arith.constant 0 : index
    %c0_10 = arith.constant 0 : index
    %11 = vector.load %arg5[%c0_9, %c0_10] : memref<1x12xf32, #tpu.memory_space<vmem>>, vector<1x12xf32>
    %12 = vector.broadcast %11 : vector<1x12xf32> to vector<16x12xf32>
    %13 = arith.addf %10, %12 : vector<16x12xf32>
    %14 = vector.extract_strided_slice %13 {offsets = [0, 0], sizes = [16, 4], strides = [1, 1]} : vector<16x12xf32> to vector<16x4xf32>
    %15 = vector.extract_strided_slice %13 {offsets = [0, 4], sizes = [16, 8], strides = [1, 1]} : vector<16x12xf32> to vector<16x8xf32>
    %cst_11 = arith.constant dense<0xFF800000> : vector<16xf32>
    %16 = vector.multi_reduction <maximumf>, %14, %cst_11 [1] : vector<16x4xf32> to vector<16xf32>
    %17 = vector.shape_cast %16 : vector<16xf32> to vector<16x1xf32>
    %18 = vector.broadcast %17 : vector<16x1xf32> to vector<16x4xf32>
    %19 = arith.subf %14, %18 : vector<16x4xf32>
    %20 = math.exp %19 : vector<16x4xf32>
    %cst_12 = arith.constant dense<0.000000e+00> : vector<16xf32>
    %21 = vector.multi_reduction <add>, %20, %cst_12 [1] : vector<16x4xf32> to vector<16xf32>
    %22 = vector.shape_cast %21 : vector<16xf32> to vector<16x1xf32>
    %23 = tpu.reciprocal %22 {approx = true} : vector<16x1xf32> -> vector<16x1xf32>
    %24 = vector.broadcast %23 : vector<16x1xf32> to vector<16x4xf32>
    %25 = arith.mulf %20, %24 : vector<16x4xf32>
    %26 = tpu.iota {dimensions = array<i32: 1>} : vector<16x4xi32>
    %cst_13 = arith.constant 0.000000e+00 : f32
    %27 = vector.broadcast %cst_13 : f32 to vector<16x4xf32>
    %cst_14 = arith.constant 0.000000e+00 : f32
    %28 = vector.broadcast %cst_14 : f32 to vector<16x4xf32>
    %cst_15 = arith.constant dense<0xFF800000> : vector<16xf32>
    %29 = vector.multi_reduction <maximumf>, %25, %cst_15 [1] : vector<16x4xf32> to vector<16xf32>
    %30 = vector.shape_cast %29 : vector<16xf32> to vector<16x1xf32>
    %31 = vector.broadcast %30 : vector<16x1xf32> to vector<16x4xf32>
    %32 = arith.cmpf oge, %25, %31 : vector<16x4xf32>
    %c4_i32 = arith.constant 4 : i32
    %33 = vector.broadcast %c4_i32 : i32 to vector<16x4xi32>
    %34 = arith.select %32, %26, %33 : vector<16x4xi1>, vector<16x4xi32>
    %cst_16 = arith.constant dense<2147483647> : vector<16xi32>
    %35 = vector.multi_reduction <minsi>, %34, %cst_16 [1] : vector<16x4xi32> to vector<16xi32>
    %36 = vector.shape_cast %35 : vector<16xi32> to vector<16x1xi32>
    %37 = vector.broadcast %36 : vector<16x1xi32> to vector<16x4xi32>
    %38 = arith.cmpi eq, %26, %37 : vector<16x4xi32>
    %39 = arith.select %38, %25, %27 : vector<16x4xi1>, vector<16x4xf32>
    %cst_17 = arith.constant 1.000000e+00 : f32
    %40 = vector.broadcast %cst_17 : f32 to vector<16x4xf32>
    %41 = arith.select %38, %40, %28 : vector<16x4xi1>, vector<16x4xf32>
    %cst_18 = arith.constant dense<0xFF800000> : vector<16xf32>
    %42 = vector.multi_reduction <maximumf>, %15, %cst_18 [1] : vector<16x8xf32> to vector<16xf32>
    %43 = vector.shape_cast %42 : vector<16xf32> to vector<16x1xf32>
    %44 = vector.broadcast %43 : vector<16x1xf32> to vector<16x8xf32>
    %45 = arith.subf %15, %44 : vector<16x8xf32>
    %46 = math.exp %45 : vector<16x8xf32>
    %47 = vector.extract_strided_slice %46 {offsets = [0, 0], sizes = [16, 2], strides = [1, 1]} : vector<16x8xf32> to vector<16x2xf32>
    %cst_19 = arith.constant dense<0.000000e+00> : vector<16xf32>
    %48 = vector.multi_reduction <add>, %47, %cst_19 [1] : vector<16x2xf32> to vector<16xf32>
    %49 = vector.shape_cast %48 : vector<16xf32> to vector<16x1xf32>
    %50 = tpu.reciprocal %49 {approx = true} : vector<16x1xf32> -> vector<16x1xf32>
    %51 = vector.broadcast %50 : vector<16x1xf32> to vector<16x2xf32>
    %52 = arith.mulf %47, %51 : vector<16x2xf32>
    %53 = vector.extract_strided_slice %39 {offsets = [0, 0], sizes = [16, 1], strides = [1, 1]} : vector<16x4xf32> to vector<16x1xf32>
    %54 = vector.broadcast %53 : vector<16x1xf32> to vector<16x2xf32>
    %55 = arith.mulf %52, %54 : vector<16x2xf32>
    %56 = vector.extract_strided_slice %46 {offsets = [0, 2], sizes = [16, 2], strides = [1, 1]} : vector<16x8xf32> to vector<16x2xf32>
    %cst_20 = arith.constant dense<0.000000e+00> : vector<16xf32>
    %57 = vector.multi_reduction <add>, %56, %cst_20 [1] : vector<16x2xf32> to vector<16xf32>
    %58 = vector.shape_cast %57 : vector<16xf32> to vector<16x1xf32>
    %59 = tpu.reciprocal %58 {approx = true} : vector<16x1xf32> -> vector<16x1xf32>
    %60 = vector.broadcast %59 : vector<16x1xf32> to vector<16x2xf32>
    %61 = arith.mulf %56, %60 : vector<16x2xf32>
    %62 = vector.extract_strided_slice %39 {offsets = [0, 1], sizes = [16, 1], strides = [1, 1]} : vector<16x4xf32> to vector<16x1xf32>
    %63 = vector.broadcast %62 : vector<16x1xf32> to vector<16x2xf32>
    %64 = arith.mulf %61, %63 : vector<16x2xf32>
    %65 = vector.extract_strided_slice %46 {offsets = [0, 4], sizes = [16, 2], strides = [1, 1]} : vector<16x8xf32> to vector<16x2xf32>
    %cst_21 = arith.constant dense<0.000000e+00> : vector<16xf32>
    %66 = vector.multi_reduction <add>, %65, %cst_21 [1] : vector<16x2xf32> to vector<16xf32>
    %67 = vector.shape_cast %66 : vector<16xf32> to vector<16x1xf32>
    %68 = tpu.reciprocal %67 {approx = true} : vector<16x1xf32> -> vector<16x1xf32>
    %69 = vector.broadcast %68 : vector<16x1xf32> to vector<16x2xf32>
    %70 = arith.mulf %65, %69 : vector<16x2xf32>
    %71 = vector.extract_strided_slice %39 {offsets = [0, 2], sizes = [16, 1], strides = [1, 1]} : vector<16x4xf32> to vector<16x1xf32>
    %72 = vector.broadcast %71 : vector<16x1xf32> to vector<16x2xf32>
    %73 = arith.mulf %70, %72 : vector<16x2xf32>
    %74 = vector.extract_strided_slice %46 {offsets = [0, 6], sizes = [16, 2], strides = [1, 1]} : vector<16x8xf32> to vector<16x2xf32>
    %cst_22 = arith.constant dense<0.000000e+00> : vector<16xf32>
    %75 = vector.multi_reduction <add>, %74, %cst_22 [1] : vector<16x2xf32> to vector<16xf32>
    %76 = vector.shape_cast %75 : vector<16xf32> to vector<16x1xf32>
    %77 = tpu.reciprocal %76 {approx = true} : vector<16x1xf32> -> vector<16x1xf32>
    %78 = vector.broadcast %77 : vector<16x1xf32> to vector<16x2xf32>
    %79 = arith.mulf %74, %78 : vector<16x2xf32>
    %80 = vector.extract_strided_slice %39 {offsets = [0, 3], sizes = [16, 1], strides = [1, 1]} : vector<16x4xf32> to vector<16x1xf32>
    %81 = vector.broadcast %80 : vector<16x1xf32> to vector<16x2xf32>
    %82 = arith.mulf %79, %81 : vector<16x2xf32>
    %83 = tpu.concatenate %55, %64, %73, %82 in 1 : vector<16x2xf32>, vector<16x2xf32>, vector<16x2xf32>, vector<16x2xf32> -> vector<16x8xf32>
    %c0_23 = arith.constant 0 : index
    %c0_24 = arith.constant 0 : index
    %84 = vector.load %arg6[%c0_23, %c0_24] : memref<16x8xf32, #tpu.memory_space<vmem>>, vector<16x8xf32>
    tpu.vector_store %arg6[%c0_23, %c0_24], %83 {strides = array<i32>} : memref<16x8xf32, #tpu.memory_space<vmem>>, vector<16x8xf32>,
    %85 = tpu.iota {dimensions = array<i32: 0>} : vector<16x1xi32>
    %c16_i32 = arith.constant 16 : i32
    %86 = arith.muli %arg0, %c16_i32 : i32
    %87 = vector.broadcast %86 : i32 to vector<16x1xi32>
    %88 = arith.addi %85, %87 : vector<16x1xi32>
    %c16_i32_25 = arith.constant 16 : i32
    %89 = vector.broadcast %c16_i32_25 : i32 to vector<16x1xi32>
    %90 = arith.cmpi slt, %88, %89 : vector<16x1xi32>
    %cst_26 = arith.constant 0.000000e+00 : f32
    %91 = vector.shape_cast %90 : vector<16x1xi1> to vector<16x1xi1>
    %92 = vector.broadcast %91 : vector<16x1xi1> to vector<16x4xi1>
    %93 = vector.broadcast %cst_26 : f32 to vector<16x4xf32>
    %94 = arith.select %92, %25, %93 : vector<16x4xi1>, vector<16x4xf32>
    %cst_27 = arith.constant dense<0.000000e+00> : vector<4xf32>
    %95 = vector.multi_reduction <add>, %94, %cst_27 [0] : vector<16x4xf32> to vector<4xf32>
    %96 = vector.shape_cast %95 : vector<4xf32> to vector<1x4xf32>
    %cst_28 = arith.constant 0.000000e+00 : f32
    %97 = vector.shape_cast %90 : vector<16x1xi1> to vector<16x1xi1>
    %98 = vector.broadcast %97 : vector<16x1xi1> to vector<16x4xi1>
    %99 = vector.broadcast %cst_28 : f32 to vector<16x4xf32>
    %100 = arith.select %98, %41, %99 : vector<16x4xi1>, vector<16x4xf32>
    %cst_29 = arith.constant dense<0.000000e+00> : vector<4xf32>
    %101 = vector.multi_reduction <add>, %100, %cst_29 [0] : vector<16x4xf32> to vector<4xf32>
    %102 = vector.shape_cast %101 : vector<4xf32> to vector<1x4xf32>
    %cst_30 = arith.constant 0.000000e+00 : f32
    %103 = vector.shape_cast %90 : vector<16x1xi1> to vector<16x1xi1>
    %104 = vector.broadcast %103 : vector<16x1xi1> to vector<16x8xi1>
    %105 = vector.broadcast %cst_30 : f32 to vector<16x8xf32>
    %106 = arith.select %104, %83, %105 : vector<16x8xi1>, vector<16x8xf32>
    %cst_31 = arith.constant dense<0.000000e+00> : vector<8xf32>
    %107 = vector.multi_reduction <add>, %106, %cst_31 [0] : vector<16x8xf32> to vector<8xf32>
    %108 = vector.shape_cast %107 : vector<8xf32> to vector<1x8xf32>
    %cst_32 = arith.constant 0.000000e+00 : f32
    %109 = vector.broadcast %cst_32 : f32 to vector<1x112xf32>
    %110 = tpu.concatenate %96, %102, %108, %109 in 1 : vector<1x4xf32>, vector<1x4xf32>, vector<1x8xf32>, vector<1x112xf32> -> vector<1x128xf32>
    %111 = vector.shape_cast %110 : vector<1x128xf32> to vector<1x1x128xf32>
    %112 = vector.shape_cast %111 : vector<1x1x128xf32> to vector<1x1x128xf32>
    %113 = vector.broadcast %112 : vector<1x1x128xf32> to vector<1x8x128xf32>
    %c0_33 = arith.constant 0 : index
    %c0_34 = arith.constant 0 : index
    %c0_35 = arith.constant 0 : index
    %114 = vector.load %arg7[%c0_33, %c0_34, %c0_35] : memref<1x8x128xf32, #tpu.memory_space<vmem>>, vector<1x8x128xf32>
    tpu.vector_store %arg7[%c0_33, %c0_34, %c0_35], %113 {strides = array<i32>} : memref<1x8x128xf32, #tpu.memory_space<vmem>>, vector<1x8x128xf32>,
    return
  }
  func.func @transform_0(%arg0: i32) -> (i32, i32) {
    %c0_i32 = arith.constant 0 : i32
    %c0_i32_0 = arith.constant 0 : i32
    return %arg0, %c0_i32 : i32, i32
  }
  func.func @transform_1(%arg0: i32) -> (i32, i32) {
    %c0_i32 = arith.constant 0 : i32
    %c0_i32_0 = arith.constant 0 : i32
    %c0_i32_1 = arith.constant 0 : i32
    return %c0_i32, %c0_i32_0 : i32, i32
  }
  func.func @transform_2(%arg0: i32) -> (i32, i32) {
    %c0_i32 = arith.constant 0 : i32
    %c0_i32_0 = arith.constant 0 : i32
    %c0_i32_1 = arith.constant 0 : i32
    return %c0_i32, %c0_i32_0 : i32, i32
  }
  func.func @transform_3(%arg0: i32) -> (i32, i32) {
    %c0_i32 = arith.constant 0 : i32
    %c0_i32_0 = arith.constant 0 : i32
    %c0_i32_1 = arith.constant 0 : i32
    return %c0_i32, %c0_i32_0 : i32, i32
  }
  func.func @transform_4(%arg0: i32) -> (i32, i32) {
    %c0_i32 = arith.constant 0 : i32
    %c0_i32_0 = arith.constant 0 : i32
    %c0_i32_1 = arith.constant 0 : i32
    return %c0_i32, %c0_i32_0 : i32, i32
  }
  func.func @transform_5(%arg0: i32) -> (i32, i32) {
    %c0_i32 = arith.constant 0 : i32
    %c0_i32_0 = arith.constant 0 : i32
    return %arg0, %c0_i32 : i32, i32
  }
  func.func @transform_6(%arg0: i32) -> (i32, i32, i32) {
    %c0_i32 = arith.constant 0 : i32
    %c0_i32_0 = arith.constant 0 : i32
    %c0_i32_1 = arith.constant 0 : i32
    return %arg0, %c0_i32, %c0_i32_0 : i32, i32, i32
  }
}

</mosaic_0001>

<bundles_post_ra>
// kernel: eq.2
= control target key start
LH: loop header
LB: loop body
LE: loop exit
PB: predicated region body
PF: predicated region fallthrough
CT: control target
= control target key end

     0   :  { %s131_s10 = smov 30   ;;  %s132_s11 = smov 26   ;;  %vm3_vm0 = vcmask 15360   ;;  %vm9_vm1 = vcmask 261360   ;;  %vm15_vm2 = vcmask 244960   ;;  %vm21_vm3 = vcmask 228560   ;;  %s207_s0 = inlined_call_operand.vmem [shape: s32[2,8,2], index: 0, kind: input, shape index: {}]   ;;  %s208_s1 = inlined_call_operand.vmem [shape: s32[32], index: 1, kind: output, shape index: {}]  }
   0x1   :  { %v101_v0 = vld [vmem:[%s207_s0 + $0xf] sm:$0x1]   ;;  %v103_v1 = vld [vmem:[%s207_s0 + $0xd] sm:$0x1]   ;;  %v105_v2 = vld [vmem:[%s207_s0 + $0xb] sm:$0x1]  }
   0x2   :  { %7 = vrot.lane.b32.xlu0 %v101_v0, %s131_s10  ;;  %19 = vrot.lane.b32.xlu1 %v103_v1, %s132_s11  ;;  %s133_s14 = smov 22   ;;  %v102_v3 = vld [vmem:[%s207_s0 + $0xe] sm:$0x1]   ;;  %v104_v4 = vld [vmem:[%s207_s0 + $0xc] sm:$0x1]   ;;  %s134_s19 = smov 28  }
   0x3   :  { %31 = vrot.lane.b32.xlu2 %v105_v2, %s133_s14  ;;  %s135_s20 = smov 24   ;;  %v106_v5 = vld [vmem:[%s207_s0 + $0xa] sm:$0x1]   ;;  %s136_s23 = smov 20   ;;  %v107_v6 = vld [vmem:[%s207_s0 + $0x9] sm:$0x1]  }
   0x4   :  { %v108_v7 = vld [vmem:[%s207_s0 + $0x8] sm:$0x1]   ;;  %s137_s28 = smov 18   ;;  %s138_s29 = smov 16   ;;  %v109_v8 = vld [vmem:[%s207_s0 + $0x7] sm:$0x1]  }
   0x5   :  { %s139_s3 = smov 14   ;;  %v110_v9 = vld [vmem:[%s207_s0 + $0x6] sm:$0x1]   ;;  %v111_v10 = vld [vmem:[%s207_s0 + $0x5] sm:$0x1]   ;;  %s140_s8 = smov 12  }
   0x6   :  { %s141_s9 = smov 10   ;;  %v112_v11 = vld [vmem:[%s207_s0 + $0x4] sm:$0x1]   ;;  %s142_s12 = smov 8   ;;  %v113_v12 = vld [vmem:[%s207_s0 + $0x3] sm:$0x1]  }
   0x7   :  { %v114_v13 = vld [vmem:[%s207_s0 + $0x2] sm:$0x1]   ;;  %s143_s17 = smov 6   ;;  %s144_s18 = smov 4   ;;  %v115_v14 = vld [vmem:[%s207_s0 + $0x1] sm:$0x1]  }
   0x8   :  { %s145_s21 = smov 2   ;;  %v2_v15 = vld [vmem:[%s207_s0] sm:$0x1]   ;;  %vm27_vm4 = vcmask 212160   ;;  %vm33_vm5 = vcmask 195760   ;;  %vm39_vm6 = vcmask 179360  }
   0x9   :  { %4 = vst.msk [vmem:[#allocation0] sm:$0x1] %vm3_vm0, %v2_v15   ;;  %vm45_vm7 = vcmask 162960   ;;  %vm51_vm8 = vcmask 146560   ;;  %vm57_vm9 = vcmask 130160   ;;  %vm63_vm10 = vcmask 113760  }
   0xa   :  { %13 = vrot.lane.b32.xlu0 %v102_v3, %s134_s19  ;;  %25 = vrot.lane.b32.xlu1 %v104_v4, %s135_s20  ;;  %vm69_vm11 = vcmask 97360   ;;  %vm75_vm12 = vcmask 80960   ;;  %vm81_vm13 = vcmask 64560   ;;  %vm87_vm14 = vcmask 48160  }
   0xb   :  { %37 = vrot.lane.b32.xlu2 %v106_v5, %s136_s23  ;;  %vm93_vm15 = vcmask 31760  }
  0x12   :  { %43 = vrot.lane.b32.xlu0 %v107_v6, %s137_s28  ;;  %49 = vrot.lane.b32.xlu1 %v108_v7, %s138_s29 }
  0x13   :  { %55 = vrot.lane.b32.xlu2 %v109_v8, %s139_s3 }
  0x1a   :  { %61 = vrot.lane.b32.xlu0 %v110_v9, %s140_s8  ;;  %67 = vrot.lane.b32.xlu1 %v111_v10, %s141_s9 }
  0x1b   :  { %73 = vrot.lane.b32.xlu2 %v112_v11, %s142_s12 }
  0x22   :  { %79 = vrot.lane.b32.xlu0 %v113_v12, %s143_s17  ;;  %85 = vrot.lane.b32.xlu1 %v114_v13, %s144_s18 }
  0x23   :  { %91 = vrot.lane.b32.xlu2 %v115_v14, %s145_s21 }
  0x5d   :  { %v32_v16 = vpop.permute.xlu2 %31  }
  0x65   :  { %v38_v17 = vpop.permute.xlu2 %37  }
  0x6d   :  { %v56_v18 = vpop.permute.xlu2 %55  }
  0x74   :  { %v8_v19 = vpop.permute.xlu0 %7   ;;  %v20_v20 = vpop.permute.xlu1 %19  }
  0x75   :  { %10 = vst.msk [vmem:[#allocation0] sm:$0x1] %vm9_vm1, %v8_v19   ;;  %v74_v21 = vpop.permute.xlu2 %73  }
  0x7c   :  { %v14_v22 = vpop.permute.xlu0 %13   ;;  %v26_v23 = vpop.permute.xlu1 %25  }
  0x7d   :  { %16 = vst.msk [vmem:[#allocation0] sm:$0x1] %vm15_vm2, %v14_v22   ;;  %v92_v24 = vpop.permute.xlu2 %91  }
  0x7e   :  { %22 = vst.msk [vmem:[#allocation0] sm:$0x1] %vm21_vm3, %v20_v20  }
  0x7f   :  { %28 = vst.msk [vmem:[#allocation0] sm:$0x1] %vm27_vm4, %v26_v23  }
  0x80   :  { %34 = vst.msk [vmem:[#allocation0] sm:$0x1] %vm33_vm5, %v32_v16  }
  0x81   :  { %40 = vst.msk [vmem:[#allocation0] sm:$0x1] %vm39_vm6, %v38_v17  }
  0x84   :  { %v44_v25 = vpop.permute.xlu0 %43   ;;  %v50_v26 = vpop.permute.xlu1 %49  }
  0x85   :  { %46 = vst.msk [vmem:[#allocation0] sm:$0x1] %vm45_vm7, %v44_v25  }
  0x86   :  { %52 = vst.msk [vmem:[#allocation0] sm:$0x1] %vm51_vm8, %v50_v26  }
  0x87   :  { %58 = vst.msk [vmem:[#allocation0] sm:$0x1] %vm57_vm9, %v56_v18  }
  0x8c   :  { %v62_v27 = vpop.permute.xlu0 %61   ;;  %v68_v28 = vpop.permute.xlu1 %67  }
  0x8d   :  { %64 = vst.msk [vmem:[#allocation0] sm:$0x1] %vm63_vm10, %v62_v27  }
  0x8e   :  { %70 = vst.msk [vmem:[#allocation0] sm:$0x1] %vm69_vm11, %v68_v28  }
  0x8f   :  { %76 = vst.msk [vmem:[#allocation0] sm:$0x1] %vm75_vm12, %v74_v21  }
  0x94   :  { %v80_v29 = vpop.permute.xlu0 %79   ;;  %v86_v30 = vpop.permute.xlu1 %85  }
  0x95   :  { %82 = vst.msk [vmem:[#allocation0] sm:$0x1] %vm81_vm13, %v80_v29  }
  0x96   :  { %88 = vst.msk [vmem:[#allocation0] sm:$0x1] %vm87_vm14, %v86_v30  }
  0x97   :  { %94 = vst.msk [vmem:[#allocation0] sm:$0x1] %vm93_vm15, %v92_v24  }
  0x9e   :  { %v97_v31 = vld [vmem:[#allocation0] sm:$0x1] }
  0x9f   :  { %100 = vst [vmem:[%s208_s1] sm:$0x1] %v97_v31 }

// kernel: hierarchical_router_forward.1
= control target key start
LH: loop header
LB: loop body
LE: loop exit
PB: predicated region body
PF: predicated region fallthrough
CT: control target
= control target key end

     0   :  { %vm50_vm0 = vcmask 261120   ;;  %vm99_vm1 = vcmask 392192   ;;  %vm117_vm2 = vcmask 31744   ;;  %vm188_vm3 = vcmask 97312   ;;  %s505_s11 = smov 118   ;;  %s511_s12 = smov 4   ;;  %s671_s1 = inlined_call_operand.vmem [shape: bf16[32,48], index: 1, kind: input, shape index: {}]   ;;  %s672_s2 = inlined_call_operand.vmem [shape: f32[1,48], index: 2, kind: input, shape index: {}]   ;;  %s673_s0 = inlined_call_operand.vmem [shape: bf16[16,32], index: 0, kind: input, shape index: {}]   ;;  %s674_s4 = inlined_call_operand.vmem [shape: f32[1,12], index: 4, kind: input, shape index: {}]   ;;  %s675_s3 = inlined_call_operand.vmem [shape: bf16[48,12], index: 3, kind: input, shape index: {}]   ;;  %s676_s5 = inlined_call_operand.vmem [shape: f32[16,8], index: 5, kind: output, shape index: {0}]   ;;  %s677_s6 = inlined_call_operand.vmem [shape: f32[1,8,128], index: 6, kind: output, shape index: {1}]  }
   0x1   :  { %v448_v0 = vld [vmem:[%s671_s1 + $0x8] sm:$0xff]  ;;  %v447_v1 = vld [vmem:[%s671_s1] sm:$0xff]  ;;  %v451_v3 = vld [vmem:[%s675_s3 + $0x10] sm:$0xff]  ;;  %vm209_vm4 = vcmask 15360   ;;  %v140_v53 = vlaneseq  ;;  %vm346_vm11 = vcmask 48128   ;;  %vm349_vm12 = vcmask 64512  }
   0x2   :  { %60 = vmatpush.bf16.msra.mxu0 %v448_v0  ;;  %v446_v2 = vld [vmem:[%s673_s0] sm:$0xff]  ;;  %108 = vmatpush.bf16.msra.mxu1 %v451_v3  ;;  %v450_v4 = vld [vmem:[%s675_s3 + $0x8] sm:$0xff]  ;;  %s512_s17 = smov 8   ;;  %vm408_vm13 = vcmask 130048  }
   0x3   :  { %v449_v5 = vld [vmem:[%s675_s3] sm:$0xff]  ;;  %s503_s3 = smov 124   ;;  %v601_v54 = vand.u32 127, %v140_v53 }
   0x4   :  { %v472_v7 = vld [vmem:[%s672_s2] ss:$0 sm:$0xff]  ;;  %s502_s2 = smov 122  }
   0x5   :  { %v473_v14 = vld [vmem:[%s674_s4] ss:$0 sm:$0xff]  ;;  %s504_s4 = smov 120  }
   0x6   :  { %61 = vmatpush.bf16.msra.mxu0 %v447_v1  ;;  %109 = vmatpush.bf16.msra.mxu1 %v450_v4 }
   0x9   :  { %432 = vmatmul.msk.bf16.vlgmr.msra.gmra.mxu0 %vm50_vm0, %v446_v2 }
   0xa   :  { %110 = vmatpush.bf16.msra.mxu1 %v449_v5 }
  0x86   :  { %v63_v6 = vpop.f32.mrf.mxu0 }
  0x87   :  { %v64_v8 = vadd.f32 %v472_v7, %v63_v6 }
  0x89   :  { %v68_v11 = vmax.f32 %v64_v8, 0.0 }
  0x8e   :  { %v65_v9 = vpop.f32.mrf.mxu0 }
  0x8f   :  { %v66_v10 = vadd.f32 %v472_v7, %v65_v9 }
  0x91   :  { %v69_v12 = vmax.f32 %v66_v10, 0.0 }
  0x93   :  { %v70_v13 = vpack.c.bf16 %v69_v12, %v68_v11 }
  0x95   :  { %445 = vmatmul.msk.bf16.vlgmr.msra.gmra.mxu1 %vm99_vm1, %v70_v13 }
 0x112   :  { %v112_v15 = vpop.f32.mrf.mxu1 }
 0x113   :  { %v113_v16 = vadd.f32 %v473_v14, %v112_v15 }
 0x115   :  { %v118_v17 = vsel %vm117_vm2, %v113_v16, -inf  ;;  %v189_v21 = vsel %vm188_vm3, %v113_v16, -inf }
 0x116   :  { %119 = vmax.xlane.f32.xlu0 %v118_v17 }
 0x11a   :  { %v114_v18 = vpop.f32.mrf.mxu1 }
 0x11b   :  { %v115_v19 = vadd.f32 %v473_v14, %v114_v18 }
 0x11d   :  { %v121_v20 = vsel %vm117_vm2, %v115_v19, -inf  ;;  %v192_v36 = vsel %vm188_vm3, %v115_v19, -inf }
 0x11e   :  { %122 = vmax.xlane.f32.xlu0 %v121_v20 }
 0x126   :  { %190 = vmax.xlane.f32.xlu0 %v189_v21 }
 0x189   :  { %v120_v22 = vpop.xlane.xlu0 %119 }
 0x18a   :  { %v124_v23 = vsub.f32 %v113_v16, %v120_v22  ;;  %v506_v22 = vmov 2  }
 0x18b   :  { %465 = vset.pattern.permute.xlu1 %v506_v22 }
 0x18c   :  { %v126_v24 = vmul.f32 1.442695, %v124_v23  ;;  %v507_v23 = vmov 1  }
 0x18d   :  { %464 = vset.pattern.permute.xlu0 %v507_v23 }
 0x18e   :  { %474 = vpow2.f32 %v126_v24  ;;  %v508_v24 = vmov 0  }
 0x18f   :  { %463 = vset.pattern.permute.xlu2 %v508_v24 }
 0x191   :  { %v123_v25 = vpop.xlane.xlu0 %122 }
 0x192   :  { %v125_v26 = vsub.f32 %v115_v19, %v123_v25 }
 0x194   :  { %v475_v27 = vpop.eup %474  ;;  %v128_v28 = vmul.f32 1.442695, %v125_v26 }
 0x195   :  { %v130_v29 = vsel %vm117_vm2, %v475_v27, 0.0 }
 0x196   :  { %476 = vpow2.f32 %v128_v28  ;;  %131 = vadd.xlane.f32.xlu1 %v130_v29 }
 0x199   :  { %v191_v30 = vpop.xlane.xlu0 %190 }
 0x19a   :  { %v195_v31 = vsub.f32 %v113_v16, %v191_v30 }
 0x19c   :  { %v477_v32 = vpop.eup %476  ;;  %v197_v33 = vmul.f32 1.442695, %v195_v31 }
 0x19d   :  { %v133_v34 = vsel %vm117_vm2, %v477_v32, 0.0 }
 0x19e   :  { %478 = vpow2.f32 %v197_v33  ;;  %134 = vadd.xlane.f32.xlu1 %v133_v34 }
 0x1a4   :  { %v577_v35 = vpop.eup %478 }
 0x1a5   :  { %232 = vrot.lane.b32.xlu2 %v577_v35, %s502_s2  ;;  %203 = vrot.lane.b32.xlu0 %v577_v35, %s503_s3 }
 0x1a6   :  { %193 = vmax.xlane.f32.xlu1 %v192_v36  ;;  %v509_v36 = vmov 3  }
 0x1ff   :  { %v233_v51 = vpop.permute.xlu2 %232 }
 0x200   :  { %v238_v4 = vsel %vm209_vm4, %v233_v51, 0.0 }
 0x209   :  { %v132_v37 = vpop.xlane.xlu1 %131 }
 0x20a   :  { %480 = vrcp.f32 %v132_v37 }
 0x210   :  { %v481_v41 = vpop.eup %480 }
 0x211   :  { %v135_v38 = vpop.xlane.xlu1 %134  ;;  %v584_v44 = vmul.f32 %v481_v41, %v475_v27 }
 0x212   :  { %482 = vrcp.f32 %v135_v38 }
 0x213   :  { %v142_v46 = vsel %vm117_vm2, %v584_v44, -inf }
 0x217   :  { %v204_v39 = vpop.permute.xlu0 %203 }
 0x218   :  { %v210_v40 = vsel %vm209_vm4, %v204_v39, 0.0  ;;  %v483_v47 = vpop.eup %482 }
 0x219   :  { %v194_v42 = vpop.xlane.xlu1 %193  ;;  %211 = vadd.xlane.f32.xlu2 %v210_v40  ;;  %v590_v49 = vmul.f32 %v483_v47, %v477_v32 }
 0x21a   :  { %v196_v43 = vsub.f32 %v115_v19, %v194_v42  ;;  %v510_v42 = vmov 0.0  }
 0x21b   :  { %v145_v50 = vsel %vm117_vm2, %v590_v49, -inf }
 0x21c   :  { %v199_v45 = vmul.f32 1.442695, %v196_v43 }
 0x21e   :  { %484 = vpow2.f32 %v199_v45 }
 0x221   :  { %143 = vmax.xlane.f32.xlu2 %v142_v46 }
 0x224   :  { %v588_v48 = vpop.eup %484 }
 0x225   :  { %205 = vrot.lane.b32.xlu1 %v588_v48, %s503_s3  ;;  %234 = vrot.lane.b32.xlu0 %v588_v48, %s502_s2 }
 0x229   :  { %146 = vmax.xlane.f32.xlu2 %v145_v50 }
 0x22d   :  { %258 = vrot.lane.b32.xlu1 %v577_v35, %s504_s4 }
 0x235   :  { %286 = vrot.lane.b32.xlu1 %v588_v48, %s505_s11 }
 0x28c   :  { %v599_v52 = vpop.xlane.xlu2 %211 }
 0x28d   :  { %486 = vrcp.f32 %v599_v52 }
 0x294   :  { %v144_v55 = vpop.xlane.xlu2 %143 }
 0x295   :  { %vm148_vm5 = vcmp.ge.f32.partialorder %v584_v44, %v144_v55 }
 0x296   :  { %v150_v56 = vsel %vm148_vm5, %v601_v54, 4 }
 0x297   :  { %v152_v57 = vsel %vm117_vm2, %v150_v56, 2147483647  ;;  %v235_v58 = vpop.permute.xlu0 %234  ;;  %v206_v3 = vpop.permute.xlu1 %205 }
 0x298   :  { %v241_v59 = vsel %vm209_vm4, %v235_v58, 0.0  ;;  %v154_v60 = vshra.s32 %v152_v57, 16  ;;  %v213_v5 = vsel %vm209_vm4, %v206_v3, 0.0  ;;  %v153_v13 = vand.u32 65535, %v152_v57 }
 0x299   :  { %242 = vadd.xlane.f32.xlu1 %v241_v59 }
 0x29a   :  { %v156_v61 = vcvt.s32.f32 %v154_v60  ;;  %v155_v14 = vcvt.s32.f32 %v153_v13 }
 0x29c   :  { %157 = vmin.xlane.f32.xlu2 %v156_v61  ;;  %v147_v62 = vpop.xlane.xlu2 %146 }
 0x29d   :  { %vm149_vm6 = vcmp.ge.f32.partialorder %v590_v49, %v147_v62 }
 0x29e   :  { %v151_v63 = vsel %vm149_vm6, %v601_v54, 4 }
 0x29f   :  { %v167_v0 = vsel %vm117_vm2, %v151_v63, 2147483647  ;;  %v259_v6 = vpop.permute.xlu1 %258 }
 0x2a0   :  { %v169_v1 = vshra.s32 %v167_v0, 16  ;;  %v264_v7 = vsel %vm209_vm4, %v259_v6, 0.0  ;;  %v168_v19 = vand.u32 65535, %v167_v0 }
 0x2a2   :  { %v171_v2 = vcvt.s32.f32 %v169_v1  ;;  %v170_v20 = vcvt.s32.f32 %v168_v19 }
 0x2a4   :  { %172 = vmin.xlane.f32.xlu0 %v171_v2 }
 0x2a7   :  { %v287_v8 = vpop.permute.xlu1 %286 }
 0x2a8   :  { %v293_v9 = vsel %vm209_vm4, %v287_v8, 0.0 }
 0x2b4   :  { %284 = vrot.lane.b32.xlu2 %v577_v35, %s505_s11 }
 0x2b8   :  { %260 = vrot.lane.b32.xlu0 %v588_v48, %s504_s4 }
 0x2dd   :  { %239 = vadd.xlane.f32.xlu2 %v238_v4 }
 0x2e2   :  { %214 = vadd.xlane.f32.xlu0 %v213_v5 }
 0x2ea   :  { %265 = vadd.xlane.f32.xlu0 %v264_v7 }
 0x2f2   :  { %294 = vadd.xlane.f32.xlu0 %v293_v9 }
 0x30c   :  { %v243_v25 = vpop.xlane.xlu1 %242 }
 0x30d   :  { %488 = vrcp.f32 %v243_v25 }
 0x30f   :  { %v158_v10 = vpop.xlane.xlu2 %157 }
 0x310   :  { %vm159_vm7 = vcmp.eq.f32.partialorder %v156_v61, %v158_v10  ;;  %v164_v27 = vcvt.f32.s32 %v158_v10 }
 0x311   :  { %v160_v15 = vsel %vm159_vm7, %v155_v14, inf }
 0x312   :  { %v165_v29 = vshll.u32 %v164_v27, 16 }
 0x317   :  { %v285_v11 = vpop.permute.xlu2 %284  ;;  %v173_v16 = vpop.xlane.xlu0 %172 }
 0x318   :  { %v290_v12 = vsel %vm209_vm4, %v285_v11, 0.0  ;;  %vm174_vm8 = vcmp.eq.f32.partialorder %v171_v2, %v173_v16  ;;  %v179_v37 = vcvt.f32.s32 %v173_v16 }
 0x319   :  { %291 = vadd.xlane.f32.xlu1 %v290_v12  ;;  %v175_v21 = vsel %vm174_vm8, %v170_v20, inf }
 0x31a   :  { %v180_v39 = vshll.u32 %v179_v37, 16 }
 0x321   :  { %161 = vmin.xlane.f32.xlu1 %v160_v15 }
 0x32a   :  { %v261_v17 = vpop.permute.xlu0 %260 }
 0x32b   :  { %v267_v18 = vsel %vm209_vm4, %v261_v17, 0.0 }
 0x32c   :  { %268 = vadd.xlane.f32.xlu2 %v267_v18 }
 0x334   :  { %176 = vmin.xlane.f32.xlu2 %v175_v21 }
 0x350   :  { %v240_v31 = vpop.xlane.xlu2 %239 }
 0x351   :  { %490 = vrcp.f32 %v240_v31 }
 0x355   :  { %v215_v53 = vpop.xlane.xlu0 %214 }
 0x35d   :  { %v266_v58 = vpop.xlane.xlu0 %265 }
 0x35e   :  { %492 = vrcp.f32 %v266_v58 }
 0x365   :  { %v295_v60 = vpop.xlane.xlu0 %294 }
 0x38c   :  { %v618_v26 = vpop.xlane.xlu1 %291 }
 0x394   :  { %v162_v28 = vpop.xlane.xlu1 %161 }
 0x395   :  { %v163_v30 = vcvt.f32.s32 %v162_v28 }
 0x397   :  { %v166_v32 = vadd.s32 %v165_v29, %v163_v30 }
 0x399   :  { %vm182_vm9 = vcmp.eq.s32.totalorder %v601_v54, %v166_v32 }
 0x39a   :  { %v184_v33 = vsel %vm182_vm9, %v584_v44, 0.0  ;;  %v186_v43 = vsel %vm182_vm9, 1.0, %v510_v42 }
 0x39b   :  { %275 = vperm.xlu1 %465, %v184_v33   ;;  %249 = vperm.xlu0 %464, %v184_v33   ;;  %v378_v47 = vsel %vm117_vm2, %v186_v43, 0.0 }
 0x39c   :  { %222 = vperm.xlu2 %463, %v184_v33  }
 0x39f   :  { %v269_v34 = vpop.xlane.xlu2 %268 }
 0x3a0   :  { %494 = vrcp.f32 %v269_v34 }
 0x3a1   :  { %496 = vrcp.f32 %v215_v53 }
 0x3a2   :  { %498 = vrcp.f32 %v295_v60 }
 0x3a3   :  { %466 = vset.pattern.permute.xlu1 %v508_v24  ;;  %471 = vset.pattern.permute.xlu0 %v509_v36  ;;  %500 = vrcp.f32 %v618_v26 }
 0x3a4   :  { %468 = vset.pattern.permute.xlu2 %v507_v23 }
 0x3a7   :  { %v177_v38 = vpop.xlane.xlu2 %176 }
 0x3a8   :  { %v178_v40 = vcvt.f32.s32 %v177_v38 }
 0x3aa   :  { %v181_v41 = vadd.s32 %v180_v39, %v178_v40 }
 0x3ac   :  { %vm183_vm10 = vcmp.eq.s32.totalorder %v601_v54, %v181_v41  ;;  %v487_v54 = vpop.eup %486 }
 0x3ad   :  { %v185_v45 = vsel %vm183_vm10, %v590_v49, 0.0  ;;  %v187_v46 = vsel %vm183_vm10, 1.0, %v510_v42  ;;  %v218_v55 = vmul.f32 %v487_v54, %v577_v35  ;;  %v489_v59 = vpop.eup %488 }
 0x3ae   :  { %v379_v50 = vsel %vm117_vm2, %v187_v46, 0.0  ;;  %253 = vperm.xlu2 %468, %v185_v45   ;;  %227 = vperm.xlu1 %466, %v185_v45   ;;  %v247_v61 = vmul.f32 %v489_v59, %v588_v48  ;;  %v491_v62 = vpop.eup %490 }
 0x3af   :  { %v380_v51 = vadd.f32 %v379_v50, %v378_v47  ;;  %v493_v0 = vpop.eup %492  ;;  %v246_v3 = vmul.f32 %v491_v62, %v577_v35 }
 0x3b0   :  { %v272_v2 = vmul.f32 %v493_v0, %v577_v35  ;;  %v495_v9 = vpop.eup %494 }
 0x3b1   :  { %v381_v1 = vrot.slane %v380_v51, 4  ;;  %v273_v12 = vmul.f32 %v495_v9, %v588_v48  ;;  %v497_v16 = vpop.eup %496 }
 0x3b2   :  { %v219_v18 = vmul.f32 %v497_v16, %v588_v48  ;;  %v499_v21 = vpop.eup %498 }
 0x3b3   :  { %v382_v8 = vadd.f32 %v381_v1, %v380_v51  ;;  %v299_v24 = vmul.f32 %v499_v21, %v588_v48 }
 0x3b5   :  { %v383_v10 = vrot.slane %v382_v8, 2 }
 0x3b6   :  { %469 = vset.pattern.permute.xlu2 %v506_v22  ;;  %467 = vset.pattern.permute.xlu1 %v509_v36  ;;  %v501_v22 = vpop.eup %500 }
 0x3b7   :  { %279 = vperm.xlu2 %469, %v185_v45   ;;  %301 = vperm.xlu1 %467, %v184_v33   ;;  %v384_v14 = vadd.f32 %v383_v10, %v382_v8  ;;  %v298_v25 = vmul.f32 %v501_v22, %v577_v35 }
 0x3b9   :  { %v385_v15 = vrot.slane %v384_v14, 1 }
 0x3bb   :  { %v386_v17 = vadd.f32 %v385_v15, %v384_v14 }
 0x3bf   :  { %470 = vset.pattern.permute.xlu2 %v509_v36 }
 0x3c0   :  { %305 = vperm.xlu2 %470, %v185_v45  }
 0x3f6   :  { %v223_v56 = vpop.permute.xlu2 %222 }
 0x3f7   :  { %v230_v57 = vmul.f32 %v223_v56, %v218_v55  ;;  %v368_v55 = vsel %vm117_vm2, %v590_v49, 0.0  ;;  %v367_v56 = vsel %vm117_vm2, %v584_v44, 0.0 }
 0x3f9   :  { %312 = vrot.lane.b32.xlu1 %v230_v57, %s503_s3  ;;  %v369_v57 = vadd.f32 %v368_v55, %v367_v56 }
 0x3fb   :  { %v370_v58 = vrot.slane %v369_v57, 4 }
 0x3fd   :  { %v371_v59 = vadd.f32 %v370_v58, %v369_v57 }
 0x3ff   :  { %v372_v60 = vrot.slane %v371_v59, 2 }
 0x408   :  { %v254_v63 = vpop.permute.xlu2 %253 }
 0x409   :  { %v257_v52 = vmul.f32 %v254_v63, %v247_v61  ;;  %v373_v61 = vadd.f32 %v372_v60, %v371_v59 }
 0x40b   :  { %322 = vrot.lane.b32.xlu1 %v257_v52, %s503_s3  ;;  %v374_v62 = vrot.slane %v373_v61, 1 }
 0x40d   :  { %v276_v4 = vpop.permute.xlu1 %275  ;;  %v250_v5 = vpop.permute.xlu0 %249  ;;  %v375_v0 = vadd.f32 %v374_v62, %v373_v61 }
 0x40e   :  { %v282_v6 = vmul.f32 %v276_v4, %v272_v2  ;;  %v256_v7 = vmul.f32 %v250_v5, %v246_v3 }
 0x410   :  { %328 = vrot.lane.b32.xlu0 %v282_v6, %s503_s3  ;;  %320 = vrot.lane.b32.xlu2 %v256_v7, %s503_s3 }
 0x411   :  { %v280_v11 = vpop.permute.xlu2 %279 }
 0x412   :  { %v283_v13 = vmul.f32 %v280_v11, %v273_v12 }
 0x418   :  { %330 = vrot.lane.b32.xlu2 %v283_v13, %s503_s3 }
 0x41a   :  { %v306_v23 = vpop.permute.xlu2 %305 }
 0x41b   :  { %v309_v27 = vmul.f32 %v306_v23, %v299_v24 }
 0x420   :  { %v228_v19 = vpop.permute.xlu1 %227  ;;  %399 = vrot.lane.b32.xlu2 %v386_v17, %s511_s12 }
 0x421   :  { %v231_v20 = vmul.f32 %v228_v19, %v219_v18 }
 0x423   :  { %314 = vrot.lane.b32.xlu0 %v231_v20, %s503_s3 }
 0x429   :  { %v302_v28 = vpop.permute.xlu1 %301 }
 0x42a   :  { %v308_v29 = vmul.f32 %v302_v28, %v298_v25 }
 0x42b   :  { %338 = vrot.lane.b32.xlu0 %v309_v27, %s503_s3 }
 0x42c   :  { %336 = vrot.lane.b32.xlu1 %v308_v29, %s503_s3 }
 0x46a   :  { %v321_v31 = vpop.permute.xlu2 %320 }
 0x46b   :  { %v313_v30 = vpop.permute.xlu1 %312 }
 0x46c   :  { %v342_v48 = vsel %vm209_vm4, %v313_v30, %v321_v31 }
 0x472   :  { %v331_v36 = vpop.permute.xlu2 %330 }
 0x47a   :  { %v400_v63 = vpop.permute.xlu2 %399 }
 0x47b   :  { %v406_v52 = vsel %vm117_vm2, %v375_v0, %v400_v63 }
 0x47d   :  { %v323_v33 = vpop.permute.xlu1 %322 }
 0x482   :  { %v329_v26 = vpop.permute.xlu0 %328 }
 0x483   :  { %v344_v38 = vsel %vm117_vm2, %v342_v48, %v329_v26 }
 0x495   :  { %v315_v32 = vpop.permute.xlu0 %314 }
 0x496   :  { %v343_v34 = vsel %vm209_vm4, %v315_v32, %v323_v33 }
 0x497   :  { %v345_v35 = vsel %vm117_vm2, %v343_v34, %v331_v36 }
 0x49d   :  { %v339_v37 = vpop.permute.xlu0 %338 }
 0x49e   :  { %v348_v39 = vsel %vm346_vm11, %v345_v35, %v339_v37  ;;  %v337_v40 = vpop.permute.xlu1 %336 }
 0x49f   :  { %351 = vst.msk [vmem:[%s676_s5 + $0x8] sm:$0xff] %vm349_vm12, %v348_v39  ;;  %v390_v41 = vsel %vm349_vm12, %v348_v39, 0.0  ;;  %v347_v42 = vsel %vm346_vm11, %v344_v38, %v337_v40 }
 0x4a0   :  { %350 = vst.msk [vmem:[%s676_s5] sm:$0xff] %vm349_vm12, %v347_v42  ;;  %v389_v43 = vsel %vm349_vm12, %v347_v42, 0.0 }
 0x4a1   :  { %v391_v45 = vadd.f32 %v390_v41, %v389_v43 }
 0x4a3   :  { %v392_v46 = vrot.slane %v391_v45, 4 }
 0x4a5   :  { %v393_v47 = vadd.f32 %v392_v46, %v391_v45 }
 0x4a7   :  { %v394_v50 = vrot.slane %v393_v47, 2 }
 0x4a9   :  { %v395_v51 = vadd.f32 %v394_v50, %v393_v47 }
 0x4ab   :  { %v396_v53 = vrot.slane %v395_v51, 1 }
 0x4ad   :  { %v397_v54 = vadd.f32 %v396_v53, %v395_v51 }
 0x4af   :  { %403 = vrot.lane.b32.xlu1 %v397_v54, %s512_s17 }
 0x521   :  { %v404_v1 = vpop.permute.xlu1 %403 }
 0x522   :  { %v407_v2 = vsel %vm349_vm12, %v406_v52, %v404_v1 }
 0x523   :  { %v409_v3 = vsel %vm408_vm13, %v407_v2, 0.0 }
 0x524   :  { %v410_v4 = vperm.slane %v409_v3, 0 }
 0x526   :  { %411 = vst [vmem:[%s677_s6] sm:$0xff] %v410_v4 }

</bundles_post_ra>
